<compile_context>
chip_gen: v7x
topology: tpu7x:2x2x1
jax: 0.10.0
libtpu: 0.0.40
codegen_flags: <defaults>
</compile_context>

<pallas_src>
import jax
import jax.numpy as jnp
from jax.experimental import pallas as pl
from jax.experimental.pallas import tpu as pltpu


def _channel_update_kernel(img_ref, wf_ref, bf_ref, out_ref, acc_ref):
    # img_ref : (ROWS, HW_TILE) input dtype (bf16/f32), ROWS = B_TILE * C
    # wf_ref  : (C, F_PAD) f32  folded weight  (w_backbone * w_map / HW)
    # bf_ref  : (1, F_PAD) f32  folded bias    (b_backbone * w_map)
    # out_ref : (B_TILE, F_PAD) f32
    # acc_ref : (ROWS, 128) f32 lane-parallel running spatial sums (VMEM scratch)
    rows, hw_tile = img_ref.shape
    c = wf_ref.shape[0]
    b_tile = out_ref.shape[0]
    hw_step = pl.program_id(1)

    @pl.when(hw_step == 0)
    def _init():
        acc_ref[...] = jnp.zeros_like(acc_ref)

    # --- hot loop: lane-aligned f32 accumulation (pure VALU adds, no per-step
    # cross-lane reduce, no relayouts).  Compute stays hidden under the DMA. ---
    n = hw_tile // 128
    if n == 1:
        acc_ref[...] += img_ref[...].astype(jnp.float32)
    else:
        def body(i, part):
            off = pl.multiple_of(i * 128, 128)
            return part + img_ref[:, pl.ds(off, 128)].astype(jnp.float32)
        acc_ref[...] += jax.lax.fori_loop(
            0, n, body, jnp.zeros((rows, 128), jnp.float32), unroll=min(n, 8))

    # --- finalize: runs once per batch tile ---
    @pl.when(hw_step == pl.num_programs(1) - 1)
    def _finalize():
        # Single cross-lane reduce (XLU), off the streaming critical path.
        pooled = jnp.sum(acc_ref[...], axis=-1, keepdims=True)           # (rows, 1)

        # In-kernel one-hot selectors (iota + add/compare only: no div/mod, no
        # resident selector buffers, no replicated weights).
        rr = jax.lax.broadcasted_iota(jnp.int32, (rows, c), 0)
        cc = jax.lax.broadcasted_iota(jnp.int32, (rows, c), 1)
        chan_hot = (rr == cc)                                            # b = 0 band
        for b in range(1, b_tile):                 # static, tiny, finalize-only
            chan_hot = chan_hot | (rr == cc + b * c)
        chan_hot = chan_hot.astype(jnp.float32)                          # (rows, c)

        bi = jax.lax.broadcasted_iota(jnp.int32, (b_tile, rows), 0)
        ri = jax.lax.broadcasted_iota(jnp.int32, (b_tile, rows), 1)
        lo = bi * c
        batch_sel = ((ri >= lo) & (ri < lo + c)).astype(jnp.float32)     # (b_tile, rows)

        # Group per-row pooled sums into (b_tile, C), then project.
        pooled_bc = jnp.dot(batch_sel, pooled * chan_hot,
                            preferred_element_type=jnp.float32,
                            precision=jax.lax.Precision.HIGHEST)         # (b_tile, c)
        feats = jnp.dot(pooled_bc, wf_ref[...],
                        preferred_element_type=jnp.float32,
                        precision=jax.lax.Precision.HIGHEST) + bf_ref[...]

        # torch.nn.functional.normalize(x, dim=-1): x * rsqrt(max(||x||^2, 1e-24))
        sumsq = jnp.sum(feats * feats, axis=-1, keepdims=True)
        out_ref[...] = feats * jax.lax.rsqrt(jnp.maximum(sumsq, 1e-24))


def _pick_b_tile(b, c):
    """Smallest batch tile whose image/output blocks satisfy TPU (8,128) rules."""
    for bt in range(1, b + 1):
        if b % bt:
            continue
        rows_ok = (bt * c) % 8 == 0 or bt == b      # img block second-minor dim
        out_ok = bt % 8 == 0 or bt == b             # out block second-minor dim
        if rows_ok and out_ok:
            return bt
    return b


def _round_up(x, m):
    return (x + m - 1) // m * m


def _vmem_capacity_bytes():
    # Trace-time hardware query; fall back to the smallest (v7x) VMEM if it fails.
    try:
        return int(pltpu.get_tpu_info().vmem_capacity_bytes)
    except Exception:
        return 64 << 20


def channel_update(images, w_backbone, b_backbone, w_map, *, hw_tile=None):
    """Fused ChannelUpdate forward.

    images     : (B, C, H, W) f32 or (preferably) bf16 — streamed at its own
                 dtype (bf16 halves HBM traffic); accumulation is f32 in-kernel.
    w_backbone : (C, F) frozen backbone linear weight
    b_backbone : (1, F) frozen backbone linear bias
    w_map      : (1, F) ElementWiseLayer weights
    returns    : (B, F) f32, L2-normalized along the last axis
    """
    B, C, H, W = images.shape
    HW = H * W
    F = w_backbone.shape[1]
    F_pad = _round_up(F, 128)

    # Fold ElementWiseLayer and the 1/HW of global-average-pool into the frozen
    # backbone parameters (exact: all are constants for this forward).  Zero-pad
    # feat_dim to a lane-dense multiple of 128 (padding doesn't change the L2
    # norm); sliced off after the kernel.
    wf = (w_backbone.astype(jnp.float32) * w_map.astype(jnp.float32)) * (1.0 / HW)
    bf = (b_backbone.astype(jnp.float32) * w_map.astype(jnp.float32)).reshape(1, F)
    if F_pad != F:
        wf = jnp.pad(wf, ((0, 0), (0, F_pad - F)))
        bf = jnp.pad(bf, ((0, 0), (0, F_pad - F)))

    b_tile = _pick_b_tile(B, C)
    rows = b_tile * C

    vmem_cap = _vmem_capacity_bytes()
    # Per-buffer image-tile budget: ~8 MiB on v7x (64 MiB VMEM), 16 MiB on
    # v5e/v6e (128 MiB VMEM).
    tile_budget = min(16 << 20, vmem_cap // 8)

    img2d = images.reshape(B * C, HW)          # dense sublane packing, no dtype cast
    if hw_tile is None:
        max_lanes = max(
            128, (tile_budget // max(rows * img2d.dtype.itemsize, 1)) // 128 * 128)
        hw_tile = int(min(_round_up(HW, 128), max_lanes))
    else:
        hw_tile = _round_up(int(hw_tile), 128)
    # Zero-pad HW so hw_tile always divides it (exact for the spatial sum since
    # 1/true_HW is already folded into wf).
    HW_pad = _round_up(HW, hw_tile)
    if HW_pad != HW:
        img2d = jnp.pad(img2d, ((0, 0), (0, HW_pad - HW)))

    grid = (B // b_tile, HW_pad // hw_tile)
    assert B % b_tile == 0 and HW_pad % hw_tile == 0

    # VMEM budget: double-buffered image stream + single-buffered constants +
    # output block + accumulator scratch + headroom; keep >= 8 MiB of physical
    # VMEM free for compiler-internal scratch (and cap at 100 MiB).
    img_bytes = rows * hw_tile * img2d.dtype.itemsize
    const_bytes = (wf.size + bf.size) * 4
    out_bytes = 2 * b_tile * F_pad * 4
    acc_bytes = rows * 128 * 4
    vmem_limit = 2 * img_bytes + const_bytes + out_bytes + acc_bytes + (4 << 20)
    vmem_limit = int(max(8 << 20, min(vmem_limit, vmem_cap - (8 << 20), 100 << 20)))

    out_padded = pl.pallas_call(
        _channel_update_kernel,
        out_shape=jax.ShapeDtypeStruct((B, F_pad), jnp.float32),
        grid_spec=pltpu.PrefetchScalarGridSpec(
            num_scalar_prefetch=0,
            grid=grid,
            in_specs=[
                # streamed image slab (double-buffered by the pipeline)
                pl.BlockSpec((rows, hw_tile), lambda b, h: (b, h)),
                # resident constants: constant index maps -> single buffer
                pl.BlockSpec((C, F_pad), lambda b, h: (0, 0),
                             pipeline_mode=pl.Buffered(1)),
                pl.BlockSpec((1, F_pad), lambda b, h: (0, 0),
                             pipeline_mode=pl.Buffered(1)),
            ],
            out_specs=pl.BlockSpec((b_tile, F_pad), lambda b, h: (b, 0)),
            scratch_shapes=[pltpu.VMEM((rows, 128), jnp.float32)],
        ),
        compiler_params=pltpu.CompilerParams(
            dimension_semantics=("parallel", "arbitrary"),
            vmem_limit_bytes=vmem_limit,
        ),
    )(img2d, wf, bf)

    return out_padded[:, :F]


if __name__ == "__main__":
    # Small deterministic shapes: batch=2, channels=4, spatial=16x16, feat_dim=32.
    B, C, H, W = 2, 4, 16, 16
    FEAT_DIM = 32

    key = jax.random.PRNGKey(0)
    k_img, k_w, k_b, k_m = jax.random.split(key, 4)

    # bf16 images from "upstream": halves the HBM bytes of the dominant image
    # stream; the kernel casts to f32 internally and accumulates in f32.
    images = jax.random.normal(k_img, (B, C, H, W), dtype=jnp.float32).astype(jnp.bfloat16)

    # Frozen synthetic backbone parameters (deterministic).
    w_backbone = jax.random.normal(k_w, (C, FEAT_DIM), dtype=jnp.float32) * 0.1
    b_backbone = jax.random.normal(k_b, (1, FEAT_DIM), dtype=jnp.float32) * 0.01

    # ElementWiseLayer: initialized to ones(1, feat_dim) in __init__; perturb
    # slightly so the weight-fold path is genuinely exercised by the check.
    w_map = (jnp.ones((1, FEAT_DIM), jnp.float32)
             + 0.05 * jax.random.normal(k_m, (1, FEAT_DIM), dtype=jnp.float32))

    # hw_tile=128 -> grid (1, 2): exercises the multi-step accumulator path.
    out = channel_update(images, w_backbone, b_backbone, w_map, hw_tile=128)
    out = jax.block_until_ready(out)

    # Pure-JAX reference (torch semantics: GAP -> Linear -> *w_map -> normalize)
    # computed from the same bf16-rounded pixels the kernel sees, in f32.
    img_f32 = images.astype(jnp.float32)
    pooled_ref = jnp.mean(img_f32.reshape(B, C, H * W), axis=-1)
    feats_ref = jnp.dot(pooled_ref, w_backbone,
                        precision=jax.lax.Precision.HIGHEST) + b_backbone
    x_ref = feats_ref * w_map
    ref = x_ref / jnp.maximum(
        jnp.sqrt(jnp.sum(x_ref * x_ref, axis=-1, keepdims=True)), 1e-12)

    assert out.shape == (B, FEAT_DIM)
    assert jnp.allclose(out, ref, atol=1e-4, rtol=1e-4), \
        float(jnp.max(jnp.abs(out - ref)))

    print("KERNEL_OK")
</pallas_src>

<mosaic_0001>
module attributes {stable_mosaic.version = 11 : i64} {
  func.func @_channel_update_kernel(%arg0: i32, %arg1: i32, %arg2: memref<8x128xbf16, #tpu.memory_space<vmem>>, %arg3: memref<4x128xf32, #tpu.memory_space<vmem>>, %arg4: memref<1x128xf32, #tpu.memory_space<vmem>>, %arg5: memref<2x128xf32, #tpu.memory_space<vmem>>, %arg6: memref<8x128xf32, #tpu.memory_space<vmem>>) attributes {dimension_semantics = [#tpu.dimension_semantics<parallel>, #tpu.dimension_semantics<arbitrary>], iteration_bounds = array<i64: 1, 2>, scalar_prefetch = 0 : i64, scratch_operands = 1 : i64, tpu.core_type = #tpu.core_type<tc>, window_params = [{transform_indices = @transform_0, window_bounds = array<i64: 8, 128>}, {pipeline_mode = #tpu.pipeline_mode<synchronous>, transform_indices = @transform_1, window_bounds = array<i64: 4, 128>}, {pipeline_mode = #tpu.pipeline_mode<synchronous>, transform_indices = @transform_2, window_bounds = array<i64: 1, 128>}, {transform_indices = @transform_3, window_bounds = array<i64: 2, 128>}]} {
    %c0_i32 = arith.constant 0 : i32
    %0 = arith.cmpi eq, %arg1, %c0_i32 : i32
    %1 = arith.extui %0 : i1 to i32
    %c0_i32_0 = arith.constant 0 : i32
    %2 = arith.cmpi ne, %1, %c0_i32_0 : i32
    scf.if %2 {
      %cst = arith.constant 0.000000e+00 : f32
      %11 = vector.broadcast %cst : f32 to vector<8x128xf32>
      %c0_7 = arith.constant 0 : index
      %c0_8 = arith.constant 0 : index
      %12 = vector.load %arg6[%c0_7, %c0_8] : memref<8x128xf32, #tpu.memory_space<vmem>>, vector<8x128xf32>
      tpu.vector_store %arg6[%c0_7, %c0_8], %11 {strides = array<i32>} : memref<8x128xf32, #tpu.memory_space<vmem>>, vector<8x128xf32>,
    } else {
    }
    %c0 = arith.constant 0 : index
    %c0_1 = arith.constant 0 : index
    %3 = vector.load %arg6[%c0, %c0_1] : memref<8x128xf32, #tpu.memory_space<vmem>>, vector<8x128xf32>
    %c0_2 = arith.constant 0 : index
    %c0_3 = arith.constant 0 : index
    %4 = vector.load %arg2[%c0_2, %c0_3] : memref<8x128xbf16, #tpu.memory_space<vmem>>, vector<8x128xbf16>
    %5 = arith.extf %4 : vector<8x128xbf16> to vector<8x128xf32>
    %6 = arith.addf %3, %5 : vector<8x128xf32>
    %c0_4 = arith.constant 0 : index
    %c0_5 = arith.constant 0 : index
    %7 = vector.load %arg6[%c0_4, %c0_5] : memref<8x128xf32, #tpu.memory_space<vmem>>, vector<8x128xf32>
    tpu.vector_store %arg6[%c0_4, %c0_5], %6 {strides = array<i32>} : memref<8x128xf32, #tpu.memory_space<vmem>>, vector<8x128xf32>,
    %c1_i32 = arith.constant 1 : i32
    %8 = arith.cmpi eq, %arg1, %c1_i32 : i32
    %9 = arith.extui %8 : i1 to i32
    %c0_i32_6 = arith.constant 0 : i32
    %10 = arith.cmpi ne, %9, %c0_i32_6 : i32
    scf.if %10 {
      %c0_7 = arith.constant 0 : index
      %c0_8 = arith.constant 0 : index
      %11 = vector.load %arg6[%c0_7, %c0_8] : memref<8x128xf32, #tpu.memory_space<vmem>>, vector<8x128xf32>
      %cst = arith.constant dense<0.000000e+00> : vector<8xf32>
      %12 = vector.multi_reduction <add>, %11, %cst [1] : vector<8x128xf32> to vector<8xf32>
      %13 = vector.shape_cast %12 : vector<8xf32> to vector<8x1xf32>
      %14 = tpu.iota {dimensions = array<i32: 0>} : vector<8x4xi32>
      %15 = tpu.iota {dimensions = array<i32: 1>} : vector<8x4xi32>
      %16 = arith.cmpi eq, %14, %15 : vector<8x4xi32>
      %c4_i32 = arith.constant 4 : i32
      %17 = vector.broadcast %c4_i32 : i32 to vector<8x4xi32>
      %18 = arith.addi %15, %17 : vector<8x4xi32>
      %19 = arith.cmpi eq, %14, %18 : vector<8x4xi32>
      %20 = arith.ori %16, %19 : vector<8x4xi1>
      %21 = arith.extui %20 : vector<8x4xi1> to vector<8x4xi32>
      %22 = arith.sitofp %21 : vector<8x4xi32> to vector<8x4xf32>
      %23 = tpu.iota {dimensions = array<i32: 0>} : vector<2x8xi32>
      %24 = tpu.iota {dimensions = array<i32: 1>} : vector<2x8xi32>
      %c4_i32_9 = arith.constant 4 : i32
      %25 = vector.broadcast %c4_i32_9 : i32 to vector<2x8xi32>
      %26 = arith.muli %23, %25 : vector<2x8xi32>
      %27 = arith.cmpi sge, %24, %26 : vector<2x8xi32>
      %c4_i32_10 = arith.constant 4 : i32
      %28 = vector.broadcast %c4_i32_10 : i32 to vector<2x8xi32>
      %29 = arith.addi %26, %28 : vector<2x8xi32>
      %30 = arith.cmpi slt, %24, %29 : vector<2x8xi32>
      %31 = arith.andi %27, %30 : vector<2x8xi1>
      %32 = arith.extui %31 : vector<2x8xi1> to vector<2x8xi32>
      %33 = arith.sitofp %32 : vector<2x8xi32> to vector<2x8xf32>
      %34 = vector.broadcast %13 : vector<8x1xf32> to vector<8x4xf32>
      %35 = arith.mulf %34, %22 : vector<8x4xf32>
      %cst_11 = arith.constant dense<0.000000e+00> : vector<2x4xf32>
      %36 = tpu.matmul %33, %35, %cst_11 {dimension_numbers = #tpu.dot_dimension_numbers<[1], [0], [0], [1], [0, 0, 1, 1], [], []>, precision = #tpu.contract_precision<fp32>} : vector<2x8xf32>, vector<8x4xf32>, vector<2x4xf32> -> vector<2x4xf32>
      %c0_12 = arith.constant 0 : index
      %c0_13 = arith.constant 0 : index
      %37 = vector.load %arg3[%c0_12, %c0_13] : memref<4x128xf32, #tpu.memory_space<vmem>>, vector<4x128xf32>
      %cst_14 = arith.constant dense<0.000000e+00> : vector<2x128xf32>
      %38 = tpu.matmul %36, %37, %cst_14 {dimension_numbers = #tpu.dot_dimension_numbers<[1], [0], [0], [1], [0, 0, 1, 1], [], []>, precision = #tpu.contract_precision<fp32>} : vector<2x4xf32>, vector<4x128xf32>, vector<2x128xf32> -> vector<2x128xf32>
      %c0_15 = arith.constant 0 : index
      %c0_16 = arith.constant 0 : index
      %39 = vector.load %arg4[%c0_15, %c0_16] : memref<1x128xf32, #tpu.memory_space<vmem>>, vector<1x128xf32>
      %40 = vector.broadcast %39 : vector<1x128xf32> to vector<2x128xf32>
      %41 = arith.addf %38, %40 : vector<2x128xf32>
      %42 = arith.mulf %41, %41 : vector<2x128xf32>
      %cst_17 = arith.constant dense<0.000000e+00> : vector<2xf32>
      %43 = vector.multi_reduction <add>, %42, %cst_17 [1] : vector<2x128xf32> to vector<2xf32>
      %44 = vector.shape_cast %43 : vector<2xf32> to vector<2x1xf32>
      %cst_18 = arith.constant 1.000000e-24 : f32
      %45 = vector.broadcast %cst_18 : f32 to vector<2x1xf32>
      %46 = arith.maximumf %44, %45 : vector<2x1xf32>
      %47 = math.rsqrt %46 : vector<2x1xf32>
      %48 = vector.broadcast %47 : vector<2x1xf32> to vector<2x128xf32>
      %49 = arith.mulf %41, %48 : vector<2x128xf32>
      %c0_19 = arith.constant 0 : index
      %c0_20 = arith.constant 0 : index
      %50 = vector.load %arg5[%c0_19, %c0_20] : memref<2x128xf32, #tpu.memory_space<vmem>>, vector<2x128xf32>
      tpu.vector_store %arg5[%c0_19, %c0_20], %49 {strides = array<i32>} : memref<2x128xf32, #tpu.memory_space<vmem>>, vector<2x128xf32>,
    } else {
    }
    return
  }
  func.func @transform_0(%arg0: i32, %arg1: i32) -> (i32, i32) {
    %c0_i32 = arith.constant 0 : i32
    return %arg0, %arg1 : i32, i32
  }
  func.func @transform_1(%arg0: i32, %arg1: i32) -> (i32, i32) {
    %c0_i32 = arith.constant 0 : i32
    %c0_i32_0 = arith.constant 0 : i32
    %c0_i32_1 = arith.constant 0 : i32
    return %c0_i32, %c0_i32_0 : i32, i32
  }
  func.func @transform_2(%arg0: i32, %arg1: i32) -> (i32, i32) {
    %c0_i32 = arith.constant 0 : i32
    %c0_i32_0 = arith.constant 0 : i32
    %c0_i32_1 = arith.constant 0 : i32
    return %c0_i32, %c0_i32_0 : i32, i32
  }
  func.func @transform_3(%arg0: i32, %arg1: i32) -> (i32, i32) {
    %c0_i32 = arith.constant 0 : i32
    %c0_i32_0 = arith.constant 0 : i32
    return %arg0, %c0_i32 : i32, i32
  }
}

</mosaic_0001>

<bundles_post_ra>
// kernel: tpu_custom_call.1
= control target key start
LH: loop header
LB: loop body
LE: loop exit
PB: predicated region body
PF: predicated region fallthrough
CT: control target
= control target key end

     0   :  { %8 = vsyncpa [#allocation4], 0  ;;  %s1855_s0 = inlined_call_operand.hbm [shape: bf16[8,256], index: 0, kind: input, shape index: {}]   ;;  %s1856_s1 = inlined_call_operand.hbm [shape: f32[4,128], index: 1, kind: input, shape index: {}]   ;;  %s1857_s2 = inlined_call_operand.vmem [shape: f32[1,128], index: 2, kind: input, shape index: {}]   ;;  %s1858_s3 = inlined_call_operand.hbm [shape: f32[2,128], index: 3, kind: output, shape index: {}]  }
   0x1   :  { %10 = vsyncpa [#allocation4 + $0x1], 0 }
   0x2   :  { %11 = vsyncpa [#allocation7], 0 }
   0x3   :  { %12 = vsyncpa [#allocation5], 0  ;;  %s1620_s12 = smov 0   ;;  %s1622_s13 = smov 0  }
   0x4   :  { %s1624_s14 = smov 0   ;;  %s1626_s15 = smov 0  }
   0x5   :  { %s1628_s16 = smov 0   ;;  %s1630_s17 = smov 0  }
   0x6 LB: > { %s1246_s18 = sadd.s32 4294967295, %s1592_s17   ;;  %p52_p0 = scmp.ne.s32.totalorder %s1576_s13, %s1572_s12  ;;  %s1592_s17 = sphi %s1630_s17, %s18_s17   ;;  %s1588_s16 = sphi %s1628_s16, %s1878_s16   ;;  %s1584_s15 = sphi %s1626_s15, %s1877_s15   ;;  %s1580_s14 = sphi %s1624_s14, %s1876_s14   ;;  %s1576_s13 = sphi %s1622_s13, %s1875_s13   ;;  %s1572_s12 = sphi %s1620_s12, %s1874_s12  }
   0x7   : > { %p1652_p1 = scmp.eq.s32.totalorder %s1246_s18, 0  ;;  %p1247_p2 = scmp.ge.s32.totalorder %s1592_s17, 1 }
   0x8   : > { %p131_p3 = scmp.lt.s32.totalorder %s1592_s17, 3  ;;  %s1594_s22 = smov [#allocation6]  }
   0x9   : > { %s1863_s19 = scalar_select %p1652_p1, 1, 0 }
   0xa   : > { %p1660_p4 = por %p1652_p1, %p52_p0  ;;  %p1664_p5 = pnand %p1247_p2, %p131_p3 }
   0xb   : > { %s144_s23 = sshll.u32 %s1594_s22, 4  ;;  %s27_s25 = sadd.s32 1, %s1588_s16  ;;  %s145_s23 = int_to_ptr.vmem [resolvable:$true] %s144_s23 }
   0xc   : > { %s1864_s20 = scalar_select %p1660_p4, 1, 0 }
   0xd   : > { %s1865_s21 = scalar_select %p1664_p5, 1, 0 }
   0xe   : > { %p1382_p6 = pneg %p1664_p5  ;;  %s39_s26 = sadd.s32 1, %s1580_s14 }
   0xf   : > { %p1678_p8 = scmp.ge.s32.totalorder %s27_s25, 2  ;;  %s1450_s30 = scalar_lea.hbm %s1856_s1, 64 }
  0x10   : > { %p1672_p7 = pnand %p1382_p6, %p1652_p1  ;;  %p1451_p9 = scmp.ne.s32.totalorder %s1856_s1, %s1450_s30 }
  0x11   : > { %s1867_s27 = scalar_select %p1678_p8, 1, 0 }
  0x12   : > { %p1452_p10 = pneg %p1672_p7  ;;  %p1457_p13 = scmp.lt.u32.totalorder %s1450_s30, %s1856_s1 }
  0x14   : > { %p1453_p11 = pnand %p1452_p10, %p1451_p9 }
  0x16   : > { %p1454_p12 = pneg %p1453_p11 }
  0x18   : > { %p1459_p0 = pnand %p1457_p13, %p1454_p12 }
  0x1a   : > { %1462 = shalt.err (!%p1459_p0)
}
  0x1b   : > { %s1463_s8 = scalar_lea.vmem %s145_s23, 64  ;;  %p1471_p1 = scmp.lt.s32.totalorder %s145_s23, %s145_s23 }
  0x1c   : > { %p1464_p2 = scmp.ne.s32.totalorder %s145_s23, %s1463_s8  ;;  %p1472_p4 = scmp.lt.s32.totalorder %s1463_s8, %s1463_s8 }
  0x1e   : > { %p1466_p3 = pnand %p1464_p2, %p1452_p10  ;;  %p1473_p5 = por %p1472_p4, %p1471_p1 }
  0x20   : > { %p1467_p6 = pneg %p1466_p3 }
  0x22   : > { %p1474_p8 = pnand %p1473_p5, %p1467_p6 }
  0x24   : > { %1477 = shalt.err (!%p1474_p8)
}
  0x25   : > { %1385 = dma.hbm_to_vmem [thread:$0]  (!%p1672_p7), %s1856_s1, 64, %s145_s23, [#allocation7]  }
  0x26   : > { %p1868_p9 = scmp.ne.s32.totalorder %s1867_s27, 0  ;;  %p46_p1 = scmp.ne.s32.totalorder %s1580_s14, %s1576_s13 }
  0x27   : > { %p47_p4 = scmp.eq.s32.totalorder %s1592_s17, 0  ;;  %p1391_p5 = scmp.lt.s32.totalorder %s1592_s17, 2 }
  0x28   : > { %s1880_s25 = smov (%p1868_p9, %s27_s25), 0  ;;  %s158_s12 = sand.u32 1, %s1580_s14  }
  0x29   : > { %s35_s11 = ssub.s32 %s1588_s16, %s1880_s25  ;;  %p48_p10 = por %p47_p4, %p46_p1 }
  0x2a   : > { %p37_p8 = scmp.eq.s32.totalorder %s35_s11, 0  ;;  %s1251_s22 = sshll.u32 %s1588_s16, 6 }
  0x2b   : > { %s1250_s28 = sshll.u32 %s158_s12, 2  ;;  %s1718_s23 = scalar_lea.hbm %s1855_s0, %s1251_s22 }
  0x2c   : > { %s1713_s24 = scalar_select %p37_p8, %s1580_s14, %s39_s26  }
  0x2d   : > { %s162_s27 = scalar_lea.vmem [#allocation3], %s1250_s28  ;;  %p1720_p7 = pnand %p1391_p5, %p48_p10 }
  0x2e   : > { %s171_s4 = sshll.u32 %s162_s27, 4  ;;  %s159_s26 = scalar_lea.sflag [#allocation4], %s158_s12  ;;  %s1724_s4 = int_to_ptr.vmem [resolvable:$true] %s171_s4 }
  0x2f   : > { %s1478_s6 = scalar_lea.hbm %s1718_s23, 64  ;;  %p1480_p12 = pneg %p1720_p7 }
  0x30   : > { %p1479_p11 = scmp.ne.s32.totalorder %s1718_s23, %s1478_s6  ;;  %s1483_s9 = scalar_lea.hbm %s1855_s0, 128 }
  0x31   : > { %p1484_p2 = scmp.lt.u32.totalorder %s1718_s23, %s1855_s0  ;;  %p1485_p3 = scmp.lt.u32.totalorder %s1483_s9, %s1478_s6 }
  0x32   : > { %p1481_p13 = pnand %p1480_p12, %p1479_p11  ;;  %p1487_p9 = scmp.lt.u32.totalorder %s1478_s6, %s1718_s23 }
  0x33   : > { %p1486_p6 = por %p1485_p3, %p1484_p2 }
  0x34   : > { %p1482_p0 = pneg %p1481_p13 }
  0x35   : > { %p1488_p1 = por %p1487_p9, %p1486_p6 }
  0x37   : > { %p1489_p4 = pnand %p1488_p1, %p1482_p0 }
  0x39   : > { %1492 = shalt.err (!%p1489_p4)
}
  0x3a   : > { %s1493_s12 = scalar_lea.vmem %s1724_s4, 64  ;;  %s1595_s22 = smov [#allocation3]  }
  0x3b   : > { %p1494_p5 = scmp.ne.s32.totalorder %s1724_s4, %s1493_s12  ;;  %s1498_s28 = sshll.u32 %s1595_s22, 4  ;;  %s1499_s28 = int_to_ptr.vmem [resolvable:$false] %s1498_s28 }
  0x3c   : > { %s1500_s29 = scalar_lea.vmem %s1499_s28, 128  ;;  %p1501_p11 = scmp.lt.s32.totalorder %s1724_s4, %s1499_s28 }
  0x3d   : > { %p1496_p8 = pnand %p1494_p5, %p1480_p12  ;;  %p1502_p13 = scmp.lt.s32.totalorder %s1500_s29, %s1493_s12 }
  0x3f   : > { %p1497_p10 = pneg %p1496_p8  ;;  %p1503_p2 = por %p1502_p13, %p1501_p11 }
  0x41   : > { %p1504_p3 = pnand %p1503_p2, %p1497_p10 }
  0x43   : > { %1507 = shalt.err (!%p1504_p3)
}
  0x44   : > { %1389 = dma.hbm_to_vmem [thread:$0]  (!%p1720_p7), %s1718_s23, 64, %s1724_s4, %s159_s26  }
  0x45   : > { %p1870_p0 = scmp.ne.s32.totalorder %s1865_s21, 0 }
  0x46   : > { %s182_s30 = sand.u32 (!%p1870_p0), 1, %s1576_s13   ;;  %p1871_p12 = scmp.ne.s32.totalorder (!%p1870_p0), %s1864_s20, 0 }
  0x47   : > { %180 = sbr.rel (%p1870_p0) target bundleno = 954 (0x3ba), region = 32  ;;  %s1253_s27 = sshll.u32 (!%p1870_p0), %s182_s30, 2 }
  0x48   : > { %s183_s6 = scalar_lea.sflag (!%p1870_p0), [#allocation4], %s182_s30  ;;  %s186_s7 = scalar_lea.vmem (!%p1870_p0), [#allocation3], %s1253_s27 }
  0x4e   : > { %1559 = dma.done.wait (%p1871_p12), %s183_s6, 64  }
  0x4f   : > { %1561 = vsyncadd (%p1871_p12), %s183_s6, 4294967232  ;;  %p1872_p6 = scmp.ne.s32.totalorder %s1863_s19, 0 }
  0x51   : > { %1563 = dma.done.wait (%p1872_p6), [#allocation7], 64  }
  0x52   : > { %1565 = vsyncadd (%p1872_p6), [#allocation7], 4294967232  ;;  %p1255_p7 = scmp.ne.s32.totalorder %s1584_s15, 0 }
  0x53   : > { %v1596_v0 = vmov (!%p1255_p7), 0.0  }
  0x54   : > { %211 = sbr.rel (%p1255_p7) target bundleno = 91 (0x5b), region = 44  ;;  %212 = vst [vmem:[#allocation2] sm:$0xff] (!%p1255_p7), %v1596_v0 }
  0x5b PF: > { %v213_v1 = vld [vmem:[#allocation2] sm:$0xff]  ;;  %v214_v2 = vld [vmem:[%s186_s7] sm:$0xf]  ;;  %p1256_p9 = scmp.ne.s32.totalorder %s1584_s15, 1 }
  0x5c   : > { %v215_v3 = vunpack.c.l.bf16 %v214_v2  ;;  %v1597_v6 = vmov (!%p1256_p9), 0.0   ;;  %vm1598_vm0 = vmmov (!%p1256_p9), 0   ;;  %v225_v7 = vlaneseq (!%p1256_p9)  ;;  %v693_v27 = vld [vmem:[#allocation6] sm:$0xf] (!%p1256_p9)  ;;  %v1262_v42 = vld [vmem:[%s1857_s2] ss:$0 sm:$0xff] (!%p1256_p9) }
  0x5d   : > { %221 = sbr.rel (%p1256_p9) target bundleno = 929 (0x3a1), region = 48  ;;  %1291 = vmatprep.subr.mxu0 (!%p1256_p9), %v1597_v6  ;;  %1321 = vmatprep.subr.mxu1 (!%p1256_p9), %v1597_v6  ;;  %vm243_vm4 = vcmask (!%p1256_p9), 64512   ;;  %vm705_vm8 = vcmask (!%p1256_p9), 1043456   ;;  %vm701_vm9 = vcmask (!%p1256_p9), 31744   ;;  %vm1156_vm10 = vcmask (!%p1256_p9), 1041408  }
  0x5e   : > { %v216_v4 = vadd.f32 %v215_v3, %v213_v1  ;;  %1293 = vmatprep.mubr.msk.f32.mxu0 (!%p1256_p9), %vm1598_vm0, %v1597_v6  ;;  %1323 = vmatprep.mubr.msk.f32.mxu1 (!%p1256_p9), %vm1598_vm0, %v1597_v6  ;;  %v226_v8 = vshrl.u32 (!%p1256_p9), %v225_v7, 7  ;;  %v228_v10 = vand.u32 (!%p1256_p9), 127, %v225_v7  ;;  %v707_v28 = vsel (!%p1256_p9), %vm705_vm8, %v693_v27, 0 }
  0x5f   : > { %v710_v29 = vand.u32 (!%p1256_p9), 4294901760, %v707_v28 }
  0x60   : > { %217 = vst [vmem:[#allocation2] sm:$0xff] %v216_v4  ;;  %v235_v9 = vmul.u32 (!%p1256_p9), 4, %v226_v8  ;;  %v230_v14 = vadd.s32 (!%p1256_p9), 4, %v228_v10  ;;  %vm229_vm5 = vcmp.eq.s32.totalorder (!%p1256_p9), %v226_v8, %v228_v10 }
  0x61   : > { %1322 = vmatpush3.msra.mxu1 (!%p1256_p9), %v710_v29  ;;  %v787_v30 = vsub.f32 (!%p1256_p9), %v707_v28, %v710_v29 }
  0x62   : > { %v237_v11 = vadd.s32 (!%p1256_p9), 4, %v235_v9  ;;  %vm236_vm1 = vcmp.ge.s32.totalorder (!%p1256_p9), %v228_v10, %v235_v9  ;;  %vm231_vm6 = vcmp.eq.s32.totalorder (!%p1256_p9), %v226_v8, %v230_v14  ;;  %1326 = vmatprep.subr.mxu1 (!%p1256_p9), %v1597_v6 }
  0x63   : > { %vm232_vm7 = vmor (!%p1256_p9), %vm229_vm5, %vm231_vm6  ;;  %v788_v34 = vand.u32 (!%p1256_p9), 4294901760, %v787_v30 }
  0x64   : > { %vm238_vm2 = vcmp.lt.s32.totalorder %v228_v10, %v237_v11  ;;  %v1257_v17 = vsel %vm232_vm7, 1.0, %v1597_v6 }
  0x65   : > { %vm239_vm3 = vmand %vm236_vm1, %vm238_vm2  ;;  %v789_v37 = vsub.f32 %v787_v30, %v788_v34 }
  0x66   : > { %v1258_v12 = vsel %vm239_vm3, 1.0, %v1597_v6 }
  0x67   : > { %v222_v5 = vld [vmem:[#allocation2] sm:$0xff]  ;;  %v245_v13 = vsel %vm243_vm4, %v1258_v12, 0  ;;  %v790_v40 = vand.u32 4294901760, %v789_v37 }
  0x68   : > { %223 = vadd.xlane.f32.xlu0 %v222_v5  ;;  %v314_v15 = vsub.f32 %v245_v13, %v245_v13 }
  0x6a   : > { %v315_v16 = vand.u32 4294901760, %v314_v15 }
  0x6c   : > { %v316_v18 = vsub.f32 %v314_v15, %v315_v16 }
  0x6e   : > { %v317_v21 = vand.u32 4294901760, %v316_v18 }
  0xf5   : > { %v224_v19 = vpop.xlane.xlu0 %223 }
  0xf6   : > { %v242_v20 = vmul.f32 %v1257_v17, %v224_v19 }
  0xf8   : > { %v248_v22 = vand.u32 4294901760, %v242_v20 }
  0xfa   : > { %v325_v23 = vsub.f32 %v242_v20, %v248_v22  ;;  %1292 = vmatpush3.msra.mxu0 %v248_v22 }
  0xfb   : > { %1294 = vmatmul.mubr.f32.vlgmr.msra.gmra.mrb[0].mxu0 %v317_v21  ;;  %1296 = vmatprep.subr.mxu0 %v1597_v6 }
  0xfc   : > { %v326_v24 = vand.u32 4294901760, %v325_v23  ;;  %1298 = vmatprep.mubr.msk.f32.mxu0 %vm1598_vm0, %v1597_v6 }
  0xfe   : > { %v327_v25 = vsub.f32 %v325_v23, %v326_v24 }
 0x100   : > { %v328_v26 = vand.u32 4294901760, %v327_v25 }
 0x102   : > { %1297 = vmatpush3.msra.mxu0 %v328_v26 }
 0x103   : > { %1299 = vmatmul.mubr.msk.f32.vlgmr.msra.gmra.mrb[0].mxu0 %vm243_vm4, %v1258_v12  ;;  %1301 = vmatprep.subr.mxu0 %v1597_v6 }
 0x104   : > { %1302 = vmatpush3.msra.mxu0 %v325_v23  ;;  %1303 = vmatprep.mubr.msk.f32.mxu0 %vm1598_vm0, %v1597_v6 }
 0x105   : > { %1306 = vmatprep.subr.mxu0 %v1597_v6 }
 0x10b   : > { %1304 = vmatmul.mubr.f32.vlgmr.msra.gmra.mrb[0].mxu0 %v314_v15 }
 0x10c   : > { %1307 = vmatpush3.msra.mxu0 %v248_v22  ;;  %1308 = vmatprep.mubr.msk.f32.mxu0 %vm1598_vm0, %v1597_v6 }
 0x10d   : > { %1311 = vmatprep.subr.mxu0 %v1597_v6 }
 0x113   : > { %1309 = vmatmul.mubr.f32.vlgmr.msra.gmra.mrb[0].mxu0 %v315_v16 }
 0x114   : > { %1312 = vmatpush3.msra.mxu0 %v326_v24  ;;  %1313 = vmatprep.mubr.msk.f32.mxu0 %vm1598_vm0, %v1597_v6 }
 0x115   : > { %1316 = vmatprep.subr.mxu0 %v1597_v6 }
 0x11b   : > { %1314 = vmatmul.mubr.msk.f32.vlgmr.msra.gmra.mrb[0].mxu0 %vm243_vm4, %v1258_v12 }
 0x11c   : > { %1317 = vmatpush3.msra.mxu0 %v248_v22  ;;  %1318 = vmatprep.mubr.msk.f32.mxu0 %vm1598_vm0, %v1597_v6 }
 0x123   : > { %1319 = vmatmul.mubr.msk.f32.vlgmr.msra.gmra.mrb[0].mxu0 %vm243_vm4, %v1258_v12 }
 0x1f6   : > { %v689_v31 = vpop.f32.mrb[0].mxu0 }
 0x1f7   : > { %v703_v32 = vsel %vm701_vm9, %v689_v31, 0  ;;  %v1320_v33 = vpop.f32.mrb[1].mxu0 }
 0x1f8   : > { %v775_v35 = vand.u32 4294901760, %v703_v32 }
 0x1fa   : > { %v776_v36 = vsub.f32 %v703_v32, %v775_v35 }
 0x1fc   : > { %v777_v38 = vand.u32 4294901760, %v776_v36 }
 0x1fe   : > { %v778_v39 = vsub.f32 %v776_v36, %v777_v38 }
 0x200   : > { %v779_v41 = vand.u32 4294901760, %v778_v39 }
 0x202   : > { %1324 = vmatmul.mubr.f32.vlgmr.msra.gmra.mrb[0].mxu1 %v779_v41 }
 0x203   : > { %1327 = vmatpush3.msra.mxu1 %v790_v40  ;;  %1328 = vmatprep.mubr.msk.f32.mxu1 %vm1598_vm0, %v1597_v6 }
 0x204   : > { %1331 = vmatprep.subr.mxu1 %v1597_v6 }
 0x20a   : > { %1329 = vmatmul.mubr.f32.vlgmr.msra.gmra.mrb[0].mxu1 %v775_v35 }
 0x20b   : > { %1332 = vmatpush3.msra.mxu1 %v787_v30  ;;  %1333 = vmatprep.mubr.msk.f32.mxu1 %vm1598_vm0, %v1597_v6 }
 0x20c   : > { %1336 = vmatprep.subr.mxu1 %v1597_v6 }
 0x212   : > { %1334 = vmatmul.mubr.f32.vlgmr.msra.gmra.mrb[0].mxu1 %v776_v36 }
 0x213   : > { %1337 = vmatpush3.msra.mxu1 %v710_v29  ;;  %1338 = vmatprep.mubr.msk.f32.mxu1 %vm1598_vm0, %v1597_v6 }
 0x214   : > { %1341 = vmatprep.subr.mxu1 %v1597_v6 }
 0x21a   : > { %1339 = vmatmul.mubr.f32.vlgmr.msra.gmra.mrb[0].mxu1 %v777_v38 }
 0x21b   : > { %1342 = vmatpush3.msra.mxu1 %v788_v34  ;;  %1343 = vmatprep.mubr.msk.f32.mxu1 %vm1598_vm0, %v1597_v6 }
 0x21c   : > { %1346 = vmatprep.subr.mxu1 %v1597_v6 }
 0x222   : > { %1344 = vmatmul.mubr.f32.vlgmr.msra.gmra.mrb[0].mxu1 %v775_v35 }
 0x223   : > { %1347 = vmatpush3.msra.mxu1 %v710_v29  ;;  %1348 = vmatprep.mubr.msk.f32.mxu1 %vm1598_vm0, %v1597_v6 }
 0x22a   : > { %1349 = vmatmul.mubr.f32.vlgmr.msra.gmra.mrb[0].mxu1 %v775_v35 }
 0x2fd   : > { %v1151_v43 = vpop.f32.mrb[0].mxu1 }
 0x2fe   : > { %v1351_v44 = vadd.f32 %v1262_v42, %v1151_v43  ;;  %v1350_v45 = vpop.f32.mrb[1].mxu1 }
 0x300   : > { %v1155_v46 = vmul.f32 %v1351_v44, %v1351_v44 }
 0x302   : > { %v1157_v47 = vsel %vm1156_vm10, %v1155_v46, 0.0 }
 0x303   : > { %1158 = vadd.xlane.f32.xlu0 %v1157_v47 }
 0x390   : > { %v1159_v48 = vpop.xlane.xlu0 %1158 }
 0x391   : > { %v1160_v49 = vmax.f32 %v1159_v48, 1e-24 }
 0x393   : > { %1448 = vrsqrt.f32 %v1160_v49 }
 0x39d   : > { %v1449_v50 = vpop.eup %1448 }
 0x39e   : > { %v1162_v51 = vmul.f32 %v1449_v50, %v1351_v44 }
 0x3a0   : > { %1163 = vst [vmem:[#allocation8] sm:$0x3] %v1162_v51 }
 0x3a1 PF: > { %p1811_p1 = scmp.eq.s32.totalorder %s1246_s18, 1  ;;  %s1599_s21 = smov [#allocation8]  }
 0x3a2   : > { %s1173_s23 = sshll.u32 %s1599_s21, 4  ;;  %s1174_s23 = int_to_ptr.vmem [resolvable:$true] %s1173_s23 }
 0x3a3   : > { %s1508_s4 = scalar_lea.vmem %s1174_s23, 32  ;;  %p1515_p10 = scmp.lt.s32.totalorder %s1174_s23, %s1174_s23 }
 0x3a4   : > { %p1509_p4 = scmp.ne.s32.totalorder %s1174_s23, %s1508_s4  ;;  %p1516_p11 = scmp.lt.s32.totalorder %s1508_s4, %s1508_s4 }
 0x3a6   : > { %p1510_p5 = pnand %p1509_p4, %p1811_p1  ;;  %p1517_p13 = por %p1516_p11, %p1515_p10 }
 0x3a8   : > { %p1511_p8 = pneg %p1510_p5 }
 0x3aa   : > { %p1518_p2 = pnand %p1517_p13, %p1511_p8 }
 0x3ac   : > { %1521 = shalt.err (!%p1518_p2)
}
 0x3ad   : > { %s1522_s18 = scalar_lea.hbm %s1858_s3, 32 }
 0x3ae   : > { %p1523_p3 = scmp.ne.s32.totalorder %s1858_s3, %s1522_s18  ;;  %p1528_p6 = scmp.lt.u32.totalorder %s1522_s18, %s1858_s3 }
 0x3b0   : > { %p1524_p0 = pnand %p1523_p3, %p1811_p1 }
 0x3b2   : > { %p1525_p12 = pneg %p1524_p0 }
 0x3b4   : > { %p1530_p7 = pnand %p1528_p6, %p1525_p12 }
 0x3b6   : > { %1533 = shalt.err (!%p1530_p7)
}
 0x3b7   : > { %1379 = dma.vmem_to_hbm [thread:$0]  (%p1811_p1), %s1174_s23, 32, %s1858_s3, [#allocation5]  }
 0x3b8   : > { %1567 = dma.done.wait (%p1811_p1), [#allocation5], 32  }
 0x3b9   : > { %1569 = vsyncadd (%p1811_p1), [#allocation5], 4294967264 }
 0x3ba PF: > { %s18_s17 = sadd.s32 1, %s1592_s17   ;;  %s1874_s12 = smov %s1576_s13 }
 0x3bb   : > { %p15_p9 = scmp.ge.s32.totalorder %s18_s17, 4   ;;  %s1875_s13 = smov %s1580_s14 }
 0x3bc   : > { %s1876_s14 = smov %s1713_s24  ;;  %s1877_s15 = smov %s1588_s16 }
 0x3bd   : > { %s1878_s16 = smov %s1880_s25  ;;  %17 = sbr.rel (!%p15_p9) target bundleno = 6 (0x6), region = 82 }
 0x3c4   :  { %1186 = vsyncpa [#allocation4], 1 }
 0x3c5   :  { %1188 = vsyncpa [#allocation4 + $0x1], 1 }
 0x3c6   :  { %1189 = vsyncpa [#allocation7], 1 }
 0x3c7   :  { %1190 = vsyncpa [#allocation5], 1 }
 0x3c8   :  { %1192 = vsyncpa [#allocation5 + $0x1], 1 }

</bundles_post_ra>
